<compile_context>
chip_gen: v6e
topology: v6e:2x2x1
jax: 0.10.0
libtpu: 0.0.40
codegen_flags: <defaults>
</compile_context>

<pallas_src>
import functools

import jax
import jax.numpy as jnp
from jax import lax
from jax.experimental import pallas as pl
from jax.experimental.pallas import tpu as pltpu

_EPS = 1e-12                            # F.normalize default eps
_VMEM_LIMIT = 48 * 1024 * 1024          # explicit scoped-VMEM limit (v7x-safe)
_TILE_VMEM_BUDGET = 40 * 1024 * 1024    # budget for pipeline buffers + partials


def _cdiv(a, b):
    return -(-a // b)


def _tico_partial_kernel(n_true, tn, tiles_per_core, matmul_bf16,
                         z1_ref, z2_ref,          # streamed (tn, D) tiles
                         b_ref, s1_ref):          # per-core partial outputs
    c = pl.program_id(0)                          # core (parallel axis)
    t = pl.program_id(1)                          # tile within core (reduction)

    @pl.when(t == 0)
    def _init():
        b_ref[...] = jnp.zeros_like(b_ref)
        s1_ref[...] = jnp.zeros_like(s1_ref)

    # Global row indices of this tile; rows >= n_true (ragged tail of the last
    # block, or fully-padded grid tiles) are zeroed so they contribute nothing.
    # jnp.where is a select, so unspecified/garbage OOB data (even NaN) in the
    # edge block is harmless.
    block_lin = c * tiles_per_core + t
    rows = block_lin * tn + lax.broadcasted_iota(jnp.int32, (tn, 1), 0)
    valid = rows < n_true

    z1 = jnp.where(valid, z1_ref[...].astype(jnp.float32), 0.0)
    z2 = jnp.where(valid, z2_ref[...].astype(jnp.float32), 0.0)

    # F.normalize: x / max(||x||, eps) == x * rsqrt(max(||x||^2, eps^2)).
    # rsqrt goes to the EUP (its own bundle slot) instead of a VALU divide.
    # Masked rows: ||x||^2 = 0 -> clamp -> finite rsqrt -> zn = 0.
    eps2 = _EPS * _EPS
    inv1 = lax.rsqrt(jnp.maximum(jnp.sum(z1 * z1, axis=-1, keepdims=True), eps2))
    inv2 = lax.rsqrt(jnp.maximum(jnp.sum(z2 * z2, axis=-1, keepdims=True), eps2))
    zn1 = z1 * inv1
    zn2 = z2 * inv2

    # Partial B += zn1^T zn1, contraction on axis 0 of both operands (the MXU
    # is fed directly, no materialized transpose).  bf16 operands, f32 accum.
    lhs = zn1.astype(jnp.bfloat16) if matmul_bf16 else zn1
    b_ref[...] += lax.dot_general(
        lhs, lhs, (((0,), (0,)), ((), ())),
        preferred_element_type=jnp.float32)

    # Cross term partial: keep as (8, D) per-sublane sums.  The reshape is a
    # layout-preserving reinterpretation of the (8, 128)-tiled layout, so the
    # axis-0 sum is pure VALU adds; the final collapse happens in the epilogue.
    prod = zn1 * zn2
    s1_ref[...] += prod.reshape(tn // 8, 8, -1).sum(axis=0)


def _choose_tile(N, D, block_n, itemsize):
    """Rows per tile: dtype-aware sublane multiple, capped by a VMEM budget."""
    sub = max(8, 32 // itemsize)                  # f32: 8, bf16: 16, 8-bit: 32
    acc_bytes = 2 * (D * D + 8 * D) * 4           # double-buffered partial outs
    avail = max(_TILE_VMEM_BUDGET - acc_bytes, 1 << 20)
    tn_cap = max(sub, avail // (4 * D * itemsize))  # 2 inputs x 2 pipeline bufs
    tn = min(int(block_n), int(tn_cap), _cdiv(N, sub) * sub)
    tn = max(sub, (tn // sub) * sub)
    return tn


def tico_loss(C, z1, z2, *, beta=0.9, rho=8.0, block_n=2048,
              matmul_bf16=True, num_cores=2):
    """Pallas TPU implementation of TiCoLoss.forward.

    Args:
      C:  (D, D) running covariance.
      z1: (N, D) projections, view 1 (f32 or bf16; streamed in native dtype).
      z2: (N, D) projections, view 2.
      block_n: max rows per grid step (rounded to the dtype sublane multiple).
      matmul_bf16: feed the z^T z matmul in bf16 with f32 accumulation
        (default).  Set False for a strictly-f32 covariance update.
      num_cores: parallel grid splits (2 uses both TCs on v7x; harmless on
        single-TC chips).
    Returns:
      (loss scalar, updated C of shape (D, D)), both float32.
    """
    N, D = z1.shape
    assert C.shape == (D, D) and z2.shape == (N, D)
    num_cores = max(1, int(num_cores))

    itemsize = jnp.dtype(z1.dtype).itemsize
    tn = _choose_tile(N, D, block_n, itemsize)
    total_tiles = _cdiv(N, tn)
    tiles_per_core = _cdiv(total_tiles, num_cores)

    kernel = functools.partial(
        _tico_partial_kernel, int(N), int(tn), int(tiles_per_core),
        bool(matmul_bf16))

    def z_map(c, t):
        # Clamp so grid-padding tiles (fully masked in-kernel) never ask for a
        # block that starts past the end of the array.
        return (jnp.minimum(c * tiles_per_core + t, total_tiles - 1), 0)

    rows_padded = num_cores * tiles_per_core * tn
    cost = pl.CostEstimate(
        flops=int(2 * rows_padded * D * D + 10 * rows_padded * D),
        transcendentals=int(2 * rows_padded),
        bytes_accessed=int(2 * rows_padded * D * itemsize
                           + 4 * num_cores * (D * D + 8 * D)),
    )

    b_part, s1_part = pl.pallas_call(
        kernel,
        out_shape=(
            jax.ShapeDtypeStruct((num_cores, D, D), jnp.float32),
            jax.ShapeDtypeStruct((num_cores, 8, D), jnp.float32),
        ),
        grid_spec=pltpu.PrefetchScalarGridSpec(
            num_scalar_prefetch=0,
            grid=(num_cores, tiles_per_core),
            in_specs=[
                pl.BlockSpec((tn, D), z_map),                    # z1 tile
                pl.BlockSpec((tn, D), z_map),                    # z2 tile
            ],
            out_specs=[
                pl.BlockSpec((None, D, D), lambda c, t: (c, 0, 0)),  # B partial
                pl.BlockSpec((None, 8, D), lambda c, t: (c, 0, 0)),  # s1 partial
            ],
        ),
        compiler_params=pltpu.CompilerParams(
            dimension_semantics=("parallel", "arbitrary"),
            vmem_limit_bytes=_VMEM_LIMIT,
        ),
        cost_estimate=cost,
    )(z1, z2)

    # Tiny O(D^2) epilogue in plain JAX: combine per-core partials, form C_new
    # and the loss.  Exact rewrite: mean_i <z1n_i C_new, z1n_i> = sum(C_new*B).
    inv_n = 1.0 / float(N)
    B = b_part.sum(axis=0) * inv_n
    C_new = beta * C.astype(jnp.float32) + (1.0 - beta) * B
    loss = -(s1_part.sum() * inv_n) + rho * jnp.sum(C_new * B)
    return loss, C_new


def _reference(C, z1, z2, beta=0.9, rho=8.0):
    z_1 = z1 / jnp.maximum(jnp.linalg.norm(z1, axis=-1, keepdims=True), _EPS)
    z_2 = z2 / jnp.maximum(jnp.linalg.norm(z2, axis=-1, keepdims=True), _EPS)
    B = (z_1.T @ z_1) / z_1.shape[0]
    C_new = beta * C + (1 - beta) * B
    loss = (-(z_1 * z_2).sum(axis=1).mean()
            + rho * ((z_1 @ C_new) * z_1).sum(axis=1).mean())
    return loss, C_new


if __name__ == "__main__":
    key = jax.random.PRNGKey(0)
    k1, k2, k3 = jax.random.split(key, 3)

    N, D = 100, 128   # N deliberately not a tile multiple; D lane-aligned
    z1 = jax.random.normal(k1, (N, D), dtype=jnp.float32)
    z2 = jax.random.normal(k2, (N, D), dtype=jnp.float32)
    C = jax.random.normal(k3, (D, D), dtype=jnp.float32) * 0.01

    ref_loss, ref_C = _reference(C, z1, z2)

    # 1) Strict f32 MXU path, small tile: exercises multi-tile accumulation,
    #    two-core partials, and ragged-tail masking.  Tight tolerance.
    f32_fn = jax.jit(functools.partial(tico_loss, block_n=32, matmul_bf16=False))
    loss_f, C_f = f32_fn(C, z1, z2)
    jax.block_until_ready((loss_f, C_f))
    assert jnp.allclose(C_f, ref_C, atol=1e-5, rtol=1e-5), (C_f, ref_C)
    assert jnp.allclose(loss_f, ref_loss, atol=1e-4, rtol=1e-4), (loss_f, ref_loss)

    # 2) Default fast path (bf16 MXU feed, default tiling).  Looser tolerance
    #    for the bf16-rounded operands (accumulation stays f32).
    fast_fn = jax.jit(tico_loss)
    loss_b, C_b = fast_fn(C, z1, z2)
    jax.block_until_ready((loss_b, C_b))
    assert jnp.allclose(C_b, ref_C, atol=1e-3, rtol=1e-2), (C_b, ref_C)
    assert jnp.allclose(loss_b, ref_loss, atol=1e-2, rtol=1e-2), (loss_b, ref_loss)

    # 3) Odd number of tiles: exercises the clamped, fully-masked padding tile
    #    on the second grid split.
    N2 = 70
    z1b = jax.random.normal(k1, (N2, D), dtype=jnp.float32)
    z2b = jax.random.normal(k2, (N2, D), dtype=jnp.float32)
    ref_loss2, ref_C2 = _reference(C, z1b, z2b)
    loss2, C2 = jax.jit(functools.partial(
        tico_loss, block_n=32, matmul_bf16=False))(C, z1b, z2b)
    jax.block_until_ready((loss2, C2))
    assert jnp.allclose(C2, ref_C2, atol=1e-5, rtol=1e-5), (C2, ref_C2)
    assert jnp.allclose(loss2, ref_loss2, atol=1e-4, rtol=1e-4), (loss2, ref_loss2)

    print("KERNEL_OK")
</pallas_src>

<mosaic_0001>
module attributes {stable_mosaic.version = 11 : i64} {
  func.func @_tico_partial_kernel(%arg0: i32, %arg1: i32, %arg2: memref<32x128xf32, #tpu.memory_space<vmem>>, %arg3: memref<32x128xf32, #tpu.memory_space<vmem>>, %arg4: memref<1x128x128xf32, #tpu.memory_space<vmem>>, %arg5: memref<1x8x128xf32, #tpu.memory_space<vmem>>) attributes {dimension_semantics = [#tpu.dimension_semantics<parallel>, #tpu.dimension_semantics<arbitrary>], iteration_bounds = array<i64: 2, 2>, scalar_prefetch = 0 : i64, scratch_operands = 0 : i64, tpu.core_type = #tpu.core_type<tc>, window_params = [{transform_indices = @transform_0, window_bounds = array<i64: 32, 128>}, {transform_indices = @transform_1, window_bounds = array<i64: 32, 128>}, {transform_indices = @transform_2, window_bounds = array<i64: 1, 128, 128>}, {transform_indices = @transform_3, window_bounds = array<i64: 1, 8, 128>}]} {
    %c0_i32 = arith.constant 0 : i32
    %0 = arith.cmpi eq, %arg1, %c0_i32 : i32
    %1 = arith.extui %0 : i1 to i32
    %c0_i32_0 = arith.constant 0 : i32
    %2 = arith.cmpi ne, %1, %c0_i32_0 : i32
    scf.if %2 {
      %cst_23 = arith.constant 0.000000e+00 : f32
      %53 = vector.broadcast %cst_23 : f32 to vector<128x128xf32>
      %c0_24 = arith.constant 0 : index
      %c0_25 = arith.constant 0 : index
      %c0_26 = arith.constant 0 : index
      %54 = vector.load %arg4[%c0_24, %c0_25, %c0_26] : memref<1x128x128xf32, #tpu.memory_space<vmem>>, vector<1x128x128xf32>
      %55 = vector.shape_cast %54 : vector<1x128x128xf32> to vector<128x128xf32>
      %56 = vector.shape_cast %53 : vector<128x128xf32> to vector<1x128x128xf32>
      tpu.vector_store %arg4[%c0_24, %c0_25, %c0_26], %56 {strides = array<i32>} : memref<1x128x128xf32, #tpu.memory_space<vmem>>, vector<1x128x128xf32>,
      %cst_27 = arith.constant 0.000000e+00 : f32
      %57 = vector.broadcast %cst_27 : f32 to vector<8x128xf32>
      %c0_28 = arith.constant 0 : index
      %c0_29 = arith.constant 0 : index
      %c0_30 = arith.constant 0 : index
      %58 = vector.load %arg5[%c0_28, %c0_29, %c0_30] : memref<1x8x128xf32, #tpu.memory_space<vmem>>, vector<1x8x128xf32>
      %59 = vector.shape_cast %58 : vector<1x8x128xf32> to vector<8x128xf32>
      %60 = vector.shape_cast %57 : vector<8x128xf32> to vector<1x8x128xf32>
      tpu.vector_store %arg5[%c0_28, %c0_29, %c0_30], %60 {strides = array<i32>} : memref<1x8x128xf32, #tpu.memory_space<vmem>>, vector<1x8x128xf32>,
    } else {
    }
    %c2_i32 = arith.constant 2 : i32
    %3 = arith.muli %arg0, %c2_i32 : i32
    %4 = arith.addi %3, %arg1 : i32
    %c32_i32 = arith.constant 32 : i32
    %5 = arith.muli %4, %c32_i32 : i32
    %6 = tpu.iota {dimensions = array<i32: 0>} : vector<32x1xi32>
    %7 = vector.broadcast %5 : i32 to vector<32x1xi32>
    %8 = arith.addi %7, %6 : vector<32x1xi32>
    %c100_i32 = arith.constant 100 : i32
    %9 = vector.broadcast %c100_i32 : i32 to vector<32x1xi32>
    %10 = arith.cmpi slt, %8, %9 : vector<32x1xi32>
    %c0 = arith.constant 0 : index
    %c0_1 = arith.constant 0 : index
    %11 = vector.load %arg2[%c0, %c0_1] : memref<32x128xf32, #tpu.memory_space<vmem>>, vector<32x128xf32>
    %cst = arith.constant 0.000000e+00 : f32
    %12 = vector.shape_cast %10 : vector<32x1xi1> to vector<32x1xi1>
    %13 = vector.broadcast %12 : vector<32x1xi1> to vector<32x128xi1>
    %14 = vector.broadcast %cst : f32 to vector<32x128xf32>
    %15 = arith.select %13, %11, %14 : vector<32x128xi1>, vector<32x128xf32>
    %c0_2 = arith.constant 0 : index
    %c0_3 = arith.constant 0 : index
    %16 = vector.load %arg3[%c0_2, %c0_3] : memref<32x128xf32, #tpu.memory_space<vmem>>, vector<32x128xf32>
    %cst_4 = arith.constant 0.000000e+00 : f32
    %17 = vector.shape_cast %10 : vector<32x1xi1> to vector<32x1xi1>
    %18 = vector.broadcast %17 : vector<32x1xi1> to vector<32x128xi1>
    %19 = vector.broadcast %cst_4 : f32 to vector<32x128xf32>
    %20 = arith.select %18, %16, %19 : vector<32x128xi1>, vector<32x128xf32>
    %21 = arith.mulf %15, %15 : vector<32x128xf32>
    %cst_5 = arith.constant dense<0.000000e+00> : vector<32xf32>
    %22 = vector.multi_reduction <add>, %21, %cst_5 [1] : vector<32x128xf32> to vector<32xf32>
    %23 = vector.shape_cast %22 : vector<32xf32> to vector<32x1xf32>
    %cst_6 = arith.constant 1.000000e-24 : f32
    %24 = vector.broadcast %cst_6 : f32 to vector<32x1xf32>
    %25 = arith.maximumf %23, %24 : vector<32x1xf32>
    %26 = math.rsqrt %25 : vector<32x1xf32>
    %27 = arith.mulf %20, %20 : vector<32x128xf32>
    %cst_7 = arith.constant dense<0.000000e+00> : vector<32xf32>
    %28 = vector.multi_reduction <add>, %27, %cst_7 [1] : vector<32x128xf32> to vector<32xf32>
    %29 = vector.shape_cast %28 : vector<32xf32> to vector<32x1xf32>
    %cst_8 = arith.constant 1.000000e-24 : f32
    %30 = vector.broadcast %cst_8 : f32 to vector<32x1xf32>
    %31 = arith.maximumf %29, %30 : vector<32x1xf32>
    %32 = math.rsqrt %31 : vector<32x1xf32>
    %33 = vector.broadcast %26 : vector<32x1xf32> to vector<32x128xf32>
    %34 = arith.mulf %15, %33 : vector<32x128xf32>
    %35 = vector.broadcast %32 : vector<32x1xf32> to vector<32x128xf32>
    %36 = arith.mulf %20, %35 : vector<32x128xf32>
    %c0_9 = arith.constant 0 : index
    %c0_10 = arith.constant 0 : index
    %c0_11 = arith.constant 0 : index
    %37 = vector.load %arg4[%c0_9, %c0_10, %c0_11] : memref<1x128x128xf32, #tpu.memory_space<vmem>>, vector<1x128x128xf32>
    %38 = vector.shape_cast %37 : vector<1x128x128xf32> to vector<128x128xf32>
    %cst_12 = arith.constant dense<0.000000e+00> : vector<128x128xf32>
    %39 = tpu.matmul %34, %34, %cst_12 {dimension_numbers = #tpu.dot_dimension_numbers<[0], [0], [1], [1], [0, 1, 1, 1], [], []>} : vector<32x128xf32>, vector<32x128xf32>, vector<128x128xf32> -> vector<128x128xf32>
    %40 = arith.addf %38, %39 : vector<128x128xf32>
    %c0_13 = arith.constant 0 : index
    %c0_14 = arith.constant 0 : index
    %c0_15 = arith.constant 0 : index
    %41 = vector.load %arg4[%c0_13, %c0_14, %c0_15] : memref<1x128x128xf32, #tpu.memory_space<vmem>>, vector<1x128x128xf32>
    %42 = vector.shape_cast %41 : vector<1x128x128xf32> to vector<128x128xf32>
    %43 = vector.shape_cast %40 : vector<128x128xf32> to vector<1x128x128xf32>
    tpu.vector_store %arg4[%c0_13, %c0_14, %c0_15], %43 {strides = array<i32>} : memref<1x128x128xf32, #tpu.memory_space<vmem>>, vector<1x128x128xf32>,
    %44 = arith.mulf %34, %36 : vector<32x128xf32>
    %c0_16 = arith.constant 0 : index
    %c0_17 = arith.constant 0 : index
    %c0_18 = arith.constant 0 : index
    %45 = vector.load %arg5[%c0_16, %c0_17, %c0_18] : memref<1x8x128xf32, #tpu.memory_space<vmem>>, vector<1x8x128xf32>
    %46 = vector.shape_cast %45 : vector<1x8x128xf32> to vector<8x128xf32>
    %47 = vector.shape_cast %44 : vector<32x128xf32> to vector<4x8x128xf32>
    %cst_19 = arith.constant dense<0.000000e+00> : vector<8x128xf32>
    %48 = vector.multi_reduction <add>, %47, %cst_19 [0] : vector<4x8x128xf32> to vector<8x128xf32>
    %49 = arith.addf %46, %48 : vector<8x128xf32>
    %c0_20 = arith.constant 0 : index
    %c0_21 = arith.constant 0 : index
    %c0_22 = arith.constant 0 : index
    %50 = vector.load %arg5[%c0_20, %c0_21, %c0_22] : memref<1x8x128xf32, #tpu.memory_space<vmem>>, vector<1x8x128xf32>
    %51 = vector.shape_cast %50 : vector<1x8x128xf32> to vector<8x128xf32>
    %52 = vector.shape_cast %49 : vector<8x128xf32> to vector<1x8x128xf32>
    tpu.vector_store %arg5[%c0_20, %c0_21, %c0_22], %52 {strides = array<i32>} : memref<1x8x128xf32, #tpu.memory_space<vmem>>, vector<1x8x128xf32>,
    return
  }
  func.func @transform_0(%arg0: i32, %arg1: i32) -> (i32, i32) {
    %c2_i32 = arith.constant 2 : i32
    %0 = arith.muli %arg0, %c2_i32 : i32
    %1 = arith.addi %0, %arg1 : i32
    %c3_i32 = arith.constant 3 : i32
    %2 = arith.minsi %1, %c3_i32 : i32
    %c0_i32 = arith.constant 0 : i32
    %c0_i32_0 = arith.constant 0 : i32
    return %2, %c0_i32 : i32, i32
  }
  func.func @transform_1(%arg0: i32, %arg1: i32) -> (i32, i32) {
    %c2_i32 = arith.constant 2 : i32
    %0 = arith.muli %arg0, %c2_i32 : i32
    %1 = arith.addi %0, %arg1 : i32
    %c3_i32 = arith.constant 3 : i32
    %2 = arith.minsi %1, %c3_i32 : i32
    %c0_i32 = arith.constant 0 : i32
    %c0_i32_0 = arith.constant 0 : i32
    return %2, %c0_i32 : i32, i32
  }
  func.func @transform_2(%arg0: i32, %arg1: i32) -> (i32, i32, i32) {
    %c0_i32 = arith.constant 0 : i32
    %c0_i32_0 = arith.constant 0 : i32
    %c0_i32_1 = arith.constant 0 : i32
    return %arg0, %c0_i32, %c0_i32_0 : i32, i32, i32
  }
  func.func @transform_3(%arg0: i32, %arg1: i32) -> (i32, i32, i32) {
    %c0_i32 = arith.constant 0 : i32
    %c0_i32_0 = arith.constant 0 : i32
    %c0_i32_1 = arith.constant 0 : i32
    return %arg0, %c0_i32, %c0_i32_0 : i32, i32, i32
  }
}

</mosaic_0001>

<bundles_post_ra>
// kernel: tico_loss.1
= control target key start
LH: loop header
LB: loop body
LE: loop exit
PB: predicated region body
PF: predicated region fallthrough
CT: control target
= control target key end

     0   :  { %9 = vsyncpa [#allocation3], 0  ;;  %s1487_s0 = inlined_call_operand.hbm [shape: f32[100,128], index: 0, kind: input, shape index: {}]   ;;  %s1488_s1 = inlined_call_operand.hbm [shape: f32[100,128], index: 1, kind: input, shape index: {}]   ;;  %s1489_s2 = inlined_call_operand.vmem [shape: f32[2,128,128], index: 2, kind: output, shape index: {0}]   ;;  %s1490_s3 = inlined_call_operand.vmem [shape: f32[2,8,128], index: 3, kind: output, shape index: {1}]  }
   0x1   :  { %11 = vsyncpa [#allocation3 + $0x1], 0 }
   0x2   :  { %12 = vsyncpa [#allocation5], 0 }
   0x3   :  { %14 = vsyncpa [#allocation5 + $0x1], 0  ;;  %s1187_s12 = smov 0   ;;  %s1189_s13 = smov 0  }
   0x4   :  { %s1191_s14 = smov 0   ;;  %s1193_s15 = smov 0  }
   0x5   :  { %s1195_s16 = smov 0   ;;  %s1197_s17 = smov 0  }
   0x6   :  { %s1199_s18 = smov 0   ;;  %s1201_s19 = smov 0  }
   0x7 LB: > { %s29_s20 = sadd.s32 1, %s1150_s17  ;;  %s32_s21 = sadd.s32 1, %s1154_s18  ;;  %s1158_s19 = sphi %s1201_s19, %s20_s19   ;;  %s1154_s18 = sphi %s1199_s18, %s1499_s18   ;;  %s1150_s17 = sphi %s1197_s17, %s1498_s17   ;;  %s1146_s16 = sphi %s1195_s16, %s1497_s16   ;;  %s1142_s15 = sphi %s1193_s15, %s1496_s15   ;;  %s1138_s14 = sphi %s1191_s14, %s1495_s14   ;;  %s1134_s13 = sphi %s1189_s13, %s1494_s13   ;;  %s1130_s12 = sphi %s1187_s12, %s1493_s12  }
   0x8   : > { %p30_p0 = scmp.ge.s32.totalorder %s29_s20, 2  ;;  %s834_s22 = sadd.s32 4294967295, %s1158_s19  }
   0x9   : > { %s836_s23 = sshll.u32 %s1154_s18, 1  ;;  %p54_p1 = scmp.ne.s32.totalorder %s1138_s14, %s1134_s13 }
   0xa   : > { %s1501_s20 = smov (%p30_p0, %s29_s20), 0  ;;  %s1503_s21 = smov (!%p30_p0, %s32_s21), %s1154_s18 }
   0xb   : > { %s37_s24 = sadd.s32 %s1150_s17, %s836_s23  ;;  %p34_p2 = scmp.ge.s32.totalorder %s1503_s21, 2 }
   0xc   : > { %p38_p3 = scmp.lt.s32.totalorder %s37_s24, 3  ;;  %p55_p4 = scmp.eq.s32.totalorder %s1158_s19, 0 }
   0xd   : > { %p60_p5 = scmp.ne.s32.totalorder %s1134_s13, %s1130_s12  ;;  %s1505_s21 = smov (%p34_p2, %s1503_s21), 0 }
   0xe   : > { %s1507_s24 = smov (!%p38_p3, %s37_s24), 3  ;;  %s837_s25 = sshll.u32 %s1505_s21, 1 }
   0xf   : > { %p1242_p6 = por %p55_p4, %p54_p1  ;;  %s41_s27 = sadd.s32 %s837_s25, %s1501_s20 }
  0x10   : > { %p61_p7 = scmp.eq.s32.totalorder %s834_s22, 0  ;;  %p42_p8 = scmp.lt.s32.totalorder %s41_s27, 3 }
  0x11   : > { %s47_s30 = sadd.s32 1, %s1138_s14  ;;  %p841_p11 = scmp.ge.s32.totalorder %s1158_s19, 4 }
  0x12   : > { %p1247_p9 = por %p61_p7, %p60_p5  ;;  %s1509_s27 = smov (!%p42_p8, %s41_s27), 3 }
  0x13   : > { %s44_s29 = ssub.s32 %s1507_s24, %s1509_s27  ;;  %166 = sbr.rel (%p841_p11) target bundleno = 88 (0x58), region = 16 }
  0x14   : > { %p45_p10 = scmp.eq.s32.totalorder %s44_s29, 0 }
  0x16   : > { %s1254_s4 = scalar_select %p45_p10, %s1138_s14, %s47_s30  }
  0x18   : > { %169 = sbr.rel (!%p1242_p6) target bundleno = 56 (0x38), region = 20  ;;  %s170_s5 = sand.u32 (%p1242_p6), 1, %s1138_s14  }
  0x19   : > { %s844_s6 = sshll.u32 (%p1242_p6), %s1507_s24, 2  ;;  %s842_s7 = sshll.u32 (%p1242_p6), %s170_s5, 5 }
  0x1a   : > { %s180_s8 = ssub.s32 (%p1242_p6), 13, %s844_s6  ;;  %s1264_s11 = scalar_lea.sflag (%p1242_p6), [#allocation3], %s170_s5 }
  0x1b   : > { %p181_p12 = scmp.lt.s32.totalorder (%p1242_p6), %s180_s8, 4  ;;  %s174_s12 = scalar_lea.vmem (%p1242_p6), [#allocation2], %s842_s7 }
  0x1d   : > { %s1511_s8 = smov (!%p181_p12, %s180_s8), 4 }
  0x1e   : > { %s1261_s9 = sshll.u32 %s1511_s8, 7 }
  0x1f   : > { %s185_s10 = ssub.s32 512, %s1261_s9 }
  0x20   : > { %186 = vsyncadd %s1264_s11, %s185_s10  ;;  %p846_p13 = scmp.ne.s32.totalorder %s1261_s9, 0  ;;  %s885_s22 = sshll.u32 %s1507_s24, 9 }
  0x21   : > { %s1272_s27 = scalar_lea.hbm %s1487_s0, %s885_s22  ;;  %s191_s29 = sshll.u32 %s174_s12, 4  ;;  %s1274_s29 = int_to_ptr.vmem [resolvable:$true] %s191_s29 }
  0x22   : > { %s1036_s30 = scalar_lea.hbm %s1272_s27, %s1261_s9  ;;  %s1040_s7 = scalar_lea.hbm %s1487_s0, 1664 }
  0x23   : > { %p1037_p0 = scmp.ne.s32.totalorder %s1272_s27, %s1036_s30  ;;  %p1042_p3 = scmp.lt.s32.totalorder %s1040_s7, %s1036_s30 }
  0x25   : > { %p1038_p1 = pnand %p1037_p0, %p846_p13 }
  0x27   : > { %p1039_p2 = pneg %p1038_p1 }
  0x29   : > { %p1044_p4 = pnand %p1042_p3, %p1039_p2 }
  0x2b   : > { %1047 = shalt.err (!%p1044_p4)
}
  0x2c   : > { %s1048_s8 = scalar_lea.vmem %s1274_s29, %s1261_s9  ;;  %s1160_s10 = smov [#allocation2]  }
  0x2d   : > { %p1049_p5 = scmp.ne.s32.totalorder %s1274_s29, %s1048_s8  ;;  %s1052_s12 = sshll.u32 %s1160_s10, 4  ;;  %s1053_s12 = int_to_ptr.vmem [resolvable:$false] %s1052_s12 }
  0x2e   : > { %s1054_s22 = scalar_lea.vmem %s1053_s12, 1024  ;;  %p1055_p10 = scmp.lt.s32.totalorder %s1274_s29, %s1053_s12 }
  0x2f   : > { %p1050_p7 = pnand %p1049_p5, %p846_p13  ;;  %p1056_p11 = scmp.lt.s32.totalorder %s1054_s22, %s1048_s8 }
  0x31   : > { %p1051_p8 = pneg %p1050_p7  ;;  %p1057_p12 = por %p1056_p11, %p1055_p10 }
  0x33   : > { %p1058_p0 = pnand %p1057_p12, %p1051_p8 }
  0x35   : > { %1061 = shalt.err (!%p1058_p0)
}
  0x36   : > { %s1161_s23 = smov 128   ;;  %s1162_s25 = smov 8  }
  0x37   : > { %197 = dma.hbm_to_vmem [thread:$0]  (%p846_p13), %s1272_s27, %s1261_s9, %s1274_s29, %s1264_s11, %s1161_s23, %s1161_s23, %s1162_s25  }
  0x38 PF: > { %200 = sbr.rel (!%p1242_p6) target bundleno = 88 (0x58), region = 24  ;;  %s201_s30 = sand.u32 (%p1242_p6), 1, %s1138_s14  }
  0x39   : > { %s852_s5 = sshll.u32 (%p1242_p6), %s1507_s24, 2  ;;  %s850_s6 = sshll.u32 (%p1242_p6), %s201_s30, 5 }
  0x3a   : > { %s211_s7 = ssub.s32 (%p1242_p6), 13, %s852_s5  ;;  %s1303_s12 = scalar_lea.sflag (%p1242_p6), [#allocation5], %s201_s30 }
  0x3b   : > { %p212_p1 = scmp.lt.s32.totalorder (%p1242_p6), %s211_s7, 4  ;;  %s205_s9 = scalar_lea.vmem (%p1242_p6), [#allocation4], %s850_s6 }
  0x3d   : > { %s1513_s7 = smov (!%p212_p1, %s211_s7), 4 }
  0x3e   : > { %s1300_s8 = sshll.u32 %s1513_s7, 7 }
  0x3f   : > { %s216_s10 = ssub.s32 512, %s1300_s8 }
  0x40   : > { %217 = vsyncadd %s1303_s12, %s216_s10  ;;  %p854_p6 = scmp.ne.s32.totalorder %s1300_s8, 0  ;;  %s886_s26 = sshll.u32 %s1507_s24, 9 }
  0x41   : > { %s1311_s29 = scalar_lea.hbm %s1488_s1, %s886_s26  ;;  %s222_s22 = sshll.u32 %s205_s9, 4  ;;  %s1313_s22 = int_to_ptr.vmem [resolvable:$true] %s222_s22 }
  0x42   : > { %s1062_s23 = scalar_lea.hbm %s1311_s29, %s1300_s8  ;;  %s1066_s5 = scalar_lea.hbm %s1488_s1, 1664 }
  0x43   : > { %p1063_p13 = scmp.ne.s32.totalorder %s1311_s29, %s1062_s23  ;;  %p1068_p4 = scmp.lt.s32.totalorder %s1066_s5, %s1062_s23 }
  0x45   : > { %p1064_p2 = pnand %p1063_p13, %p854_p6 }
  0x47   : > { %p1065_p3 = pneg %p1064_p2 }
  0x49   : > { %p1070_p5 = pnand %p1068_p4, %p1065_p3 }
  0x4b   : > { %1073 = shalt.err (!%p1070_p5)
}
  0x4c   : > { %s1074_s24 = scalar_lea.vmem %s1313_s22, %s1300_s8  ;;  %s1163_s6 = smov [#allocation4]  }
  0x4d   : > { %p1075_p7 = scmp.ne.s32.totalorder %s1313_s22, %s1074_s24  ;;  %s1078_s7 = sshll.u32 %s1163_s6, 4  ;;  %s1079_s7 = int_to_ptr.vmem [resolvable:$false] %s1078_s7 }
  0x4e   : > { %s1080_s10 = scalar_lea.vmem %s1079_s7, 1024  ;;  %p1081_p11 = scmp.lt.s32.totalorder %s1313_s22, %s1079_s7 }
  0x4f   : > { %p1076_p8 = pnand %p1075_p7, %p854_p6  ;;  %p1082_p12 = scmp.lt.s32.totalorder %s1080_s10, %s1074_s24 }
  0x51   : > { %p1077_p10 = pneg %p1076_p8  ;;  %p1083_p0 = por %p1082_p12, %p1081_p11 }
  0x53   : > { %p1084_p1 = pnand %p1083_p0, %p1077_p10 }
  0x55   : > { %1087 = shalt.err (!%p1084_p1)
}
  0x56   : > { %s1164_s9 = smov 128   ;;  %s1165_s26 = smov 8  }
  0x57   : > { %228 = dma.hbm_to_vmem [thread:$0]  (%p854_p6), %s1311_s29, %s1300_s8, %s1313_s22, %s1303_s12, %s1164_s9, %s1164_s9, %s1165_s26  }
  0x58 PF: > { %p858_p13 = scmp.ge.s32.totalorder %s1158_s19, 1  ;;  %p230_p2 = scmp.lt.s32.totalorder %s1158_s19, 5 }
  0x5a   : > { %p231_p3 = pnand %p858_p13, %p230_p2 }
  0x5b   : > { %s236_s11 = sand.u32 (!%p231_p3), 1, %s1134_s13  }
  0x5c   : > { %234 = sbr.rel (%p231_p3) target bundleno = 668 (0x29c), region = 28  ;;  %s859_s27 = sshll.u32 (!%p231_p3), %s236_s11, 5 }
  0x5d   : > { %s237_s23 = scalar_lea.sflag (!%p231_p3), [#allocation3], %s236_s11  ;;  %s1338_s25 = scalar_lea.vmem (!%p231_p3), [#allocation2], %s859_s27 }
  0x61   : > { %1121 = dma.done.wait (%p1247_p9), %s237_s23, 512  }
  0x62   : > { %1123 = vsyncadd (%p1247_p9), %s237_s23, 4294966784  ;;  %s246_s8 = scalar_lea.sflag [#allocation5], %s236_s11  ;;  %s1344_s12 = scalar_lea.vmem [#allocation4], %s859_s27 }
  0x63   : > { %1125 = dma.done.wait (%p1247_p9), %s246_s8, 512  }
  0x64   : > { %1127 = vsyncadd (%p1247_p9), %s246_s8, 4294966784  ;;  %p299_p6 = scmp.lt.s32.totalorder %s1146_s16, 1  ;;  %p864_p4 = scmp.ne.s32.totalorder %s1142_s15, 0 }
  0x66   : > { %s300_s29 = scalar_select %p299_p6, %s1146_s16, 1 }
  0x67   : > { %311 = sbr.rel (%p864_p4) target bundleno = 118 (0x76), region = 40 }
  0x68   : > { %s887_s22 = sshll.u32 %s300_s29, 7  ;;  %s863_s30 = sshll.u32 %s300_s29, 3 }
  0x69   : > { %s1355_s6 = scalar_lea.vmem %s1489_s2, %s887_s22  ;;  %s1360_s9 = scalar_lea.vmem %s1490_s3, %s863_s30 }
  0x6c   : > { %v1166_v0 = vmov 0.0  }
  0x6d   : > { %312 = vst [vmem:[%s1355_s6] sm:$0xff] %v1166_v0  ;;  %313 = vst [vmem:[%s1355_s6 + $0x8] sm:$0xff] %v1166_v0 }
  0x6e   : > { %314 = vst [vmem:[%s1355_s6 + $0x10] sm:$0xff] %v1166_v0  ;;  %315 = vst [vmem:[%s1355_s6 + $0x18] sm:$0xff] %v1166_v0 }
  0x6f   : > { %316 = vst [vmem:[%s1355_s6 + $0x20] sm:$0xff] %v1166_v0  ;;  %317 = vst [vmem:[%s1355_s6 + $0x28] sm:$0xff] %v1166_v0 }
  0x70   : > { %318 = vst [vmem:[%s1355_s6 + $0x30] sm:$0xff] %v1166_v0  ;;  %319 = vst [vmem:[%s1355_s6 + $0x38] sm:$0xff] %v1166_v0 }
  0x71   : > { %320 = vst [vmem:[%s1355_s6 + $0x40] sm:$0xff] %v1166_v0  ;;  %321 = vst [vmem:[%s1355_s6 + $0x48] sm:$0xff] %v1166_v0 }
  0x72   : > { %322 = vst [vmem:[%s1355_s6 + $0x50] sm:$0xff] %v1166_v0  ;;  %323 = vst [vmem:[%s1355_s6 + $0x58] sm:$0xff] %v1166_v0 }
  0x73   : > { %324 = vst [vmem:[%s1355_s6 + $0x60] sm:$0xff] %v1166_v0  ;;  %325 = vst [vmem:[%s1355_s6 + $0x68] sm:$0xff] %v1166_v0 }
  0x74   : > { %326 = vst [vmem:[%s1355_s6 + $0x70] sm:$0xff] %v1166_v0  ;;  %327 = vst [vmem:[%s1355_s6 + $0x78] sm:$0xff] %v1166_v0 }
  0x75   : > { %328 = vst [vmem:[%s1360_s9] sm:$0xff] %v1166_v0 }
  0x76 PF: > { %s865_s28 = sshll.u32 %s1146_s16, 1  ;;  %v332_v1 = vlaneseq  ;;  %v346_v5 = vld [vmem:[%s1338_s25] sm:$0xff]  ;;  %v348_v10 = vld [vmem:[%s1338_s25 + $0x10] sm:$0xff]  ;;  %v347_v12 = vld [vmem:[%s1338_s25 + $0x8] sm:$0xff]  ;;  %vm466_vm4 = vcmask 261120  }
  0x77   : > { %s330_s26 = sadd.s32 %s1142_s15, %s865_s28  ;;  %v349_v14 = vld [vmem:[%s1338_s25 + $0x18] sm:$0xff]  ;;  %v362_v22 = vld [vmem:[%s1344_s12] sm:$0xff]  ;;  %v363_v25 = vld [vmem:[%s1344_s12 + $0x8] sm:$0xff] }
  0x78   : > { %s866_s11 = sshll.u32 %s330_s26, 5  ;;  %v333_v2 = vshrl.u32 %v332_v1, 7  ;;  %v364_v28 = vld [vmem:[%s1344_s12 + $0x10] sm:$0xff]  ;;  %v365_v31 = vld [vmem:[%s1344_s12 + $0x18] sm:$0xff] }
  0x79   : > { %v337_v3 = vstv %s866_s11 }
  0x7a   : > { %v338_v4 = vadd.s32 %v337_v3, %v333_v2  ;;  %v335_v6 = vadd.s32 16, %v333_v2  ;;  %v334_v7 = vadd.s32 8, %v333_v2  ;;  %v336_v8 = vadd.s32 24, %v333_v2 }
  0x7c   : > { %vm342_vm0 = vcmp.lt.s32.totalorder %v338_v4, 100  ;;  %v340_v9 = vadd.s32 %v337_v3, %v335_v6  ;;  %v339_v11 = vadd.s32 %v337_v3, %v334_v7  ;;  %v341_v13 = vadd.s32 %v337_v3, %v336_v8 }
  0x7d   : > { %v358_v15 = vsel %vm342_vm0, %v346_v5, 0.0  ;;  %v1392_v24 = vsel %vm342_vm0, %v362_v22, 0.0 }
  0x7e   : > { %v370_v16 = vmul.f32 %v358_v15, %v358_v15  ;;  %vm344_vm1 = vcmp.lt.s32.totalorder %v340_v9, 100  ;;  %vm343_vm2 = vcmp.lt.s32.totalorder %v339_v11, 100  ;;  %vm345_vm3 = vcmp.lt.s32.totalorder %v341_v13, 100  ;;  %v696_v9 = vld [vmem:[%s1360_s9] sm:$0xff] }
  0x7f   : > { %v360_v17 = vsel %vm344_vm1, %v348_v10, 0.0  ;;  %v359_v18 = vsel %vm343_vm2, %v347_v12, 0.0  ;;  %v361_v19 = vsel %vm345_vm3, %v349_v14, 0.0  ;;  %v390_v26 = vmul.f32 %v1392_v24, %v1392_v24 }
  0x80   : > { %374 = vadd.xlane.f32.xlu0 %v370_v16  ;;  %v372_v20 = vmul.f32 %v360_v17, %v360_v17  ;;  %v371_v21 = vmul.f32 %v359_v18, %v359_v18  ;;  %v373_v23 = vmul.f32 %v361_v19, %v361_v19  ;;  %v367_v27 = vsel %vm343_vm2, %v363_v25, 0.0 }
  0x81   : > { %v391_v29 = vmul.f32 %v367_v27, %v367_v27  ;;  %v1400_v30 = vsel %vm344_vm1, %v364_v28, 0.0  ;;  %v1406_v33 = vsel %vm345_vm3, %v365_v31, 0.0  ;;  %v419_v28 = vld [vmem:[%s1355_s6 + $0x8] sm:$0xff] }
  0x82   : > { %378 = vadd.xlane.f32.xlu1 %v372_v20  ;;  %v392_v32 = vmul.f32 %v1400_v30, %v1400_v30  ;;  %v393_v34 = vmul.f32 %v1406_v33, %v1406_v33 }
  0x84   : > { %376 = vadd.xlane.f32.xlu0 %v371_v21 }
  0x86   : > { %380 = vadd.xlane.f32.xlu1 %v373_v23 }
  0x8a   : > { %394 = vadd.xlane.f32.xlu1 %v390_v26 }
  0x8e   : > { %396 = vadd.xlane.f32.xlu1 %v391_v29 }
  0x92   : > { %398 = vadd.xlane.f32.xlu1 %v392_v32 }
  0x96   : > { %400 = vadd.xlane.f32.xlu1 %v393_v34  ;;  %v421_v34 = vld [vmem:[%s1355_s6 + $0x18] sm:$0xff] }
 0x109   : > { %v375_v35 = vpop.xlane.xlu0 %374 }
 0x10a   : > { %v382_v36 = vmax.f32 %v375_v35, 1e-24 }
 0x10b   : > { %v379_v37 = vpop.xlane.xlu1 %378 }
 0x10c   : > { %1020 = vrsqrt.f32 %v382_v36  ;;  %v384_v38 = vmax.f32 %v379_v37, 1e-24  ;;  %v420_v36 = vld [vmem:[%s1355_s6 + $0x10] sm:$0xff] }
 0x10d   : > { %v377_v39 = vpop.xlane.xlu0 %376 }
 0x10e   : > { %v383_v40 = vmax.f32 %v377_v39, 1e-24  ;;  %1022 = vrsqrt.f32 %v384_v38 }
 0x10f   : > { %v381_v41 = vpop.xlane.xlu1 %380 }
 0x110   : > { %1024 = vrsqrt.f32 %v383_v40  ;;  %v385_v42 = vmax.f32 %v381_v41, 1e-24  ;;  %v423_v40 = vld [vmem:[%s1355_s6 + $0x28] sm:$0xff] }
 0x112   : > { %1026 = vrsqrt.f32 %v385_v42  ;;  %v422_v42 = vld [vmem:[%s1355_s6 + $0x20] sm:$0xff] }
 0x113   : > { %v395_v43 = vpop.xlane.xlu1 %394 }
 0x114   : > { %v402_v44 = vmax.f32 %v395_v43, 1e-24 }
 0x116   : > { %1028 = vrsqrt.f32 %v402_v44 }
 0x117   : > { %v397_v45 = vpop.xlane.xlu1 %396 }
 0x118   : > { %v403_v46 = vmax.f32 %v397_v45, 1e-24 }
 0x119   : > { %v1021_v47 = vpop.eup %1020 }
 0x11a   : > { %v410_v48 = vmul.f32 %v1021_v47, %v358_v15  ;;  %1030 = vrsqrt.f32 %v403_v46  ;;  %v425_v46 = vld [vmem:[%s1355_s6 + $0x38] sm:$0xff] }
 0x11b   : > { %v399_v49 = vpop.xlane.xlu1 %398  ;;  %v1023_v50 = vpop.eup %1022 }
 0x11c   : > { %v404_v51 = vmax.f32 %v399_v49, 1e-24  ;;  %434 = vxpose.xlu0.b32.start [1/4] (short) %v410_v48, 128  ;;  %v412_v56 = vmul.f32 %v1023_v50, %v360_v17 }
 0x11d   : > { %v1025_v52 = vpop.eup %1024 }
 0x11e   : > { %v411_v53 = vmul.f32 %v1025_v52, %v359_v18  ;;  %1032 = vrsqrt.f32 %v404_v51  ;;  %v427_v52 = vld [vmem:[%s1355_s6 + $0x48] sm:$0xff] }
 0x11f   : > { %v1027_v54 = vpop.eup %1026  ;;  %v401_v55 = vpop.xlane.xlu1 %400 }
 0x120   : > { %v413_v57 = vmul.f32 %v1027_v54, %v361_v19  ;;  %v405_v58 = vmax.f32 %v401_v55, 1e-24  ;;  %435 = vxpose.xlu0.b32.cont [2/4] (short) %v411_v53, 128  ;;  %v426_v54 = vld [vmem:[%s1355_s6 + $0x40] sm:$0xff] }
 0x122   : > { %1034 = vrsqrt.f32 %v405_v58  ;;  %908 = vmatprep.subr.mxu0 %v413_v57  ;;  %940 = vmatprep.subr.mxu1 %v413_v57  ;;  %v429_v58 = vld [vmem:[%s1355_s6 + $0x58] sm:$0xff] }
 0x123   : > { %909 = vmatpush3.msra.mxu0 %v413_v57  ;;  %944 = vmatpush3.msra.mxu1 %v413_v57  ;;  %v1029_v59 = vpop.eup %1028 }
 0x124   : > { %910 = vmatprep.subr.mxu0 %v412_v56  ;;  %941 = vmatprep.subr.mxu1 %v412_v56  ;;  %v414_v62 = vmul.f32 %v1029_v59, %v1392_v24 }
 0x125   : > { %436 = vxpose.xlu0.b32.cont [3/4] (short) %v412_v56, 128  ;;  %911 = vmatpush3.msra.mxu0 %v412_v56 }
 0x126   : > { %945 = vmatpush3.msra.mxu1 %v412_v56  ;;  %912 = vmatprep.subr.mxu0 %v411_v53  ;;  %v692_v2 = vmul.f32 %v414_v62, %v410_v48 }
 0x127   : > { %v1031_v60 = vpop.eup %1030  ;;  %942 = vmatprep.subr.mxu1 %v411_v53  ;;  %913 = vmatpush3.msra.mxu0 %v411_v53 }
 0x128   : > { %v415_v61 = vmul.f32 %v1031_v60, %v367_v27  ;;  %946 = vmatpush3.msra.mxu1 %v411_v53  ;;  %914 = vmatprep.subr.mxu0 %v410_v48  ;;  %v428_v60 = vld [vmem:[%s1355_s6 + $0x50] sm:$0xff] }
 0x129   : > { %437 = vxpose.xlu0.b32.end [4/4] (short) %v413_v57, 128  ;;  %943 = vmatprep.subr.mxu1 %v410_v48 }
 0x12a   : > { %915 = vmatpush3.msra.mxu0 %v410_v48  ;;  %947 = vmatpush3.msra.mxu1 %v410_v48  ;;  %v693_v0 = vmul.f32 %v415_v61, %v411_v53  ;;  %v424_v48 = vld [vmem:[%s1355_s6 + $0x30] sm:$0xff] }
 0x12b   : > { %v1033_v63 = vpop.eup %1032 }
 0x12c   : > { %v416_v1 = vmul.f32 %v1033_v63, %v1400_v30  ;;  %v697_v5 = vadd.f32 %v693_v0, %v692_v2  ;;  %v418_v30 = vld [vmem:[%s1355_s6] sm:$0xff]  ;;  %v431_v0 = vld [vmem:[%s1355_s6 + $0x68] sm:$0xff] }
 0x12d   : > { %v430_v2 = vld [vmem:[%s1355_s6 + $0x60] sm:$0xff] }
 0x12e   : > { %v694_v3 = vmul.f32 %v416_v1, %v412_v56 }
 0x12f   : > { %v1035_v4 = vpop.eup %1034 }
 0x130   : > { %v417_v6 = vmul.f32 %v1035_v4, %v1406_v33  ;;  %v698_v7 = vadd.f32 %v697_v5, %v694_v3 }
 0x132   : > { %v695_v8 = vmul.f32 %v417_v6, %v413_v57  ;;  %v433_v6 = vld [vmem:[%s1355_s6 + $0x78] sm:$0xff] }
 0x134   : > { %v699_v10 = vadd.f32 %v698_v7, %v695_v8  ;;  %v432_v8 = vld [vmem:[%s1355_s6 + $0x70] sm:$0xff] }
 0x136   : > { %v700_v11 = vadd.f32 %v699_v10, %v696_v9 }
 0x138   : > { %701 = vst [vmem:[%s1360_s9] sm:$0xff] %v700_v11 }
 0x199   : > { %v450_v12 = vpop.trf.xlu0 }
 0x19a   : > { %916 = vmatprep.mubr.msk.f32.mxu0 %vm466_vm4, %v450_v12 }
 0x19d   : > { %v451_v13 = vpop.trf.xlu0 }
 0x19e   : > { %917 = vmatmul.mubr.msk.f32.vlgmr.msra.gmra.mxu0 %vm466_vm4, %v451_v13 }
 0x1a1   : > { %v452_v14 = vpop.trf.xlu0 }
 0x1a2   : > { %919 = vmatprep.mubr.msk.f32.mxu0 %vm466_vm4, %v452_v14 }
 0x1a5   : > { %v453_v15 = vpop.trf.xlu0 }
 0x1a6   : > { %920 = vmatmul.mubr.msk.f32.gmra.mxu0 %vm466_vm4, %v453_v15 }
 0x1a9   : > { %v454_v16 = vpop.trf.xlu0 }
 0x1aa   : > { %922 = vmatprep.mubr.msk.f32.mxu0 %vm466_vm4, %v454_v16 }
 0x1ad   : > { %v455_v17 = vpop.trf.xlu0 }
 0x1ae   : > { %923 = vmatmul.mubr.msk.f32.gmra.mxu0 %vm466_vm4, %v455_v17 }
 0x1b1   : > { %v456_v18 = vpop.trf.xlu0 }
 0x1b2   : > { %925 = vmatprep.mubr.msk.f32.mxu0 %vm466_vm4, %v456_v18 }
 0x1b5   : > { %v457_v19 = vpop.trf.xlu0 }
 0x1b6   : > { %926 = vmatmul.mubr.msk.f32.gmra.mxu0 %vm466_vm4, %v457_v19 }
 0x1b9   : > { %v458_v20 = vpop.trf.xlu0 }
 0x1ba   : > { %928 = vmatprep.mubr.msk.f32.mxu1 %vm466_vm4, %v458_v20 }
 0x1bd   : > { %v459_v21 = vpop.trf.xlu0 }
 0x1be   : > { %929 = vmatmul.mubr.msk.f32.vlgmr.msra.gmra.mxu1 %vm466_vm4, %v459_v21 }
 0x1c1   : > { %v460_v22 = vpop.trf.xlu0 }
 0x1c2   : > { %931 = vmatprep.mubr.msk.f32.mxu1 %vm466_vm4, %v460_v22 }
 0x1c5   : > { %v461_v23 = vpop.trf.xlu0 }
 0x1c6   : > { %932 = vmatmul.mubr.msk.f32.gmra.mxu1 %vm466_vm4, %v461_v23 }
 0x1c9   : > { %v462_v24 = vpop.trf.xlu0 }
 0x1ca   : > { %934 = vmatprep.mubr.msk.f32.mxu1 %vm466_vm4, %v462_v24 }
 0x1cd   : > { %v463_v25 = vpop.trf.xlu0 }
 0x1ce   : > { %935 = vmatmul.mubr.msk.f32.gmra.mxu1 %vm466_vm4, %v463_v25 }
 0x1d1   : > { %v464_v26 = vpop.trf.xlu0 }
 0x1d2   : > { %937 = vmatprep.mubr.msk.f32.mxu1 %vm466_vm4, %v464_v26 }
 0x1d5   : > { %v465_v27 = vpop.trf.xlu0 }
 0x1d6   : > { %938 = vmatmul.mubr.msk.f32.gmra.mxu1 %vm466_vm4, %v465_v27 }
 0x25e   : > { %v918_v29 = vpop.f32.mrf.mxu0 }
 0x25f   : > { %v661_v31 = vadd.f32 %v918_v29, %v419_v28 }
 0x260   : > { %v581_v32 = vpop.f32.mrf.mxu0 }
 0x261   : > { %677 = vst [vmem:[%s1355_s6 + $0x8] sm:$0xff] %v661_v31  ;;  %v660_v33 = vadd.f32 %v581_v32, %v418_v30 }
 0x263   : > { %676 = vst [vmem:[%s1355_s6] sm:$0xff] %v660_v33 }
 0x266   : > { %v921_v35 = vpop.f32.mrf.mxu0 }
 0x267   : > { %v663_v37 = vadd.f32 %v921_v35, %v421_v34 }
 0x268   : > { %v591_v38 = vpop.f32.mrf.mxu0 }
 0x269   : > { %679 = vst [vmem:[%s1355_s6 + $0x18] sm:$0xff] %v663_v37  ;;  %v662_v39 = vadd.f32 %v591_v38, %v420_v36 }
 0x26b   : > { %678 = vst [vmem:[%s1355_s6 + $0x10] sm:$0xff] %v662_v39 }
 0x26e   : > { %v924_v41 = vpop.f32.mrf.mxu0 }
 0x26f   : > { %v665_v43 = vadd.f32 %v924_v41, %v423_v40 }
 0x270   : > { %v601_v44 = vpop.f32.mrf.mxu0 }
 0x271   : > { %681 = vst [vmem:[%s1355_s6 + $0x28] sm:$0xff] %v665_v43  ;;  %v664_v45 = vadd.f32 %v601_v44, %v422_v42 }
 0x273   : > { %680 = vst [vmem:[%s1355_s6 + $0x20] sm:$0xff] %v664_v45 }
 0x276   : > { %v927_v47 = vpop.f32.mrf.mxu0 }
 0x277   : > { %v667_v49 = vadd.f32 %v927_v47, %v425_v46 }
 0x278   : > { %v611_v50 = vpop.f32.mrf.mxu0 }
 0x279   : > { %683 = vst [vmem:[%s1355_s6 + $0x38] sm:$0xff] %v667_v49  ;;  %v666_v51 = vadd.f32 %v611_v50, %v424_v48 }
 0x27b   : > { %682 = vst [vmem:[%s1355_s6 + $0x30] sm:$0xff] %v666_v51 }
 0x27e   : > { %v930_v53 = vpop.f32.mrf.mxu1 }
 0x27f   : > { %v669_v55 = vadd.f32 %v930_v53, %v427_v52 }
 0x280   : > { %v621_v56 = vpop.f32.mrf.mxu1 }
 0x281   : > { %685 = vst [vmem:[%s1355_s6 + $0x48] sm:$0xff] %v669_v55  ;;  %v668_v57 = vadd.f32 %v621_v56, %v426_v54 }
 0x283   : > { %684 = vst [vmem:[%s1355_s6 + $0x40] sm:$0xff] %v668_v57 }
 0x286   : > { %v933_v59 = vpop.f32.mrf.mxu1 }
 0x287   : > { %v671_v61 = vadd.f32 %v933_v59, %v429_v58 }
 0x288   : > { %v631_v62 = vpop.f32.mrf.mxu1 }
 0x289   : > { %687 = vst [vmem:[%s1355_s6 + $0x58] sm:$0xff] %v671_v61  ;;  %v670_v63 = vadd.f32 %v631_v62, %v428_v60 }
 0x28b   : > { %686 = vst [vmem:[%s1355_s6 + $0x50] sm:$0xff] %v670_v63 }
 0x28e   : > { %v936_v1 = vpop.f32.mrf.mxu1 }
 0x28f   : > { %v673_v3 = vadd.f32 %v936_v1, %v431_v0 }
 0x290   : > { %v641_v4 = vpop.f32.mrf.mxu1 }
 0x291   : > { %689 = vst [vmem:[%s1355_s6 + $0x68] sm:$0xff] %v673_v3  ;;  %v672_v5 = vadd.f32 %v641_v4, %v430_v2 }
 0x293   : > { %688 = vst [vmem:[%s1355_s6 + $0x60] sm:$0xff] %v672_v5 }
 0x296   : > { %v939_v7 = vpop.f32.mrf.mxu1 }
 0x297   : > { %v675_v9 = vadd.f32 %v939_v7, %v433_v6 }
 0x298   : > { %v651_v10 = vpop.f32.mrf.mxu1 }
 0x299   : > { %691 = vst [vmem:[%s1355_s6 + $0x78] sm:$0xff] %v675_v9  ;;  %v674_v11 = vadd.f32 %v651_v10, %v432_v8 }
 0x29b   : > { %690 = vst [vmem:[%s1355_s6 + $0x70] sm:$0xff] %v674_v11 }
 0x29c PF: > { %s20_s19 = sadd.s32 1, %s1158_s19   ;;  %s1493_s12 = smov %s1134_s13 }
 0x29d   : > { %p17_p9 = scmp.ge.s32.totalorder %s20_s19, 6   ;;  %s1494_s13 = smov %s1138_s14 }
 0x29e   : > { %s1495_s14 = smov %s1254_s4  ;;  %s1496_s15 = smov %s1150_s17 }
 0x29f   : > { %s1497_s16 = smov %s1154_s18  ;;  %s1498_s17 = smov %s1501_s20 }
 0x2a0   : > { %s1499_s18 = smov %s1505_s21  ;;  %19 = sbr.rel (!%p17_p9) target bundleno = 7 (0x7), region = 97 }
 0x2a5   :  { %737 = vsyncpa [#allocation3], 1 }
 0x2a6   :  { %739 = vsyncpa [#allocation3 + $0x1], 1 }
 0x2a7   :  { %740 = vsyncpa [#allocation5], 1 }
 0x2a8   :  { %742 = vsyncpa [#allocation5 + $0x1], 1 }

</bundles_post_ra>
